<compile_context>
chip_gen: v6e
topology: v6e:2x2x1
jax: 0.10.0
libtpu: 0.0.40
codegen_flags: <defaults>
</compile_context>

<pallas_src>
import jax
import jax.numpy as jnp
from jax.experimental import pallas as pl
from jax.experimental.pallas import tpu as pltpu


def _hbm_copy_kernel(x_hbm, o_hbm, sem):
    # Whole-slab HBM->HBM DMA.  One descriptor; the DMA engine runs at memory
    # bandwidth while the TensorCore stays idle (no vld/vst, no VMEM).
    cp = pltpu.make_async_copy(x_hbm, o_hbm, sem)
    cp.start()
    cp.wait()


def expand_temporal_dim(x_seq: jax.Array, T: int, *, use_pallas_copy: bool = True) -> jax.Array:
    """(T*B, C, H, W) -> (T, B, C, H, W), matching torch .view semantics."""
    TB = x_seq.shape[0]
    assert TB % T == 0, "leading dim must be divisible by T"
    B = TB // T
    out_shape = (T, B) + tuple(x_seq.shape[1:])

    if not use_pallas_copy:
        # Zero-cost metadata reshape — the true production hot path.
        return jnp.reshape(x_seq, out_shape)

    # Metadata-only reshape so the kernel's src/dst shapes match exactly.
    x_view = jnp.reshape(x_seq, out_shape)
    nbytes = x_view.size * jnp.dtype(x_view.dtype).itemsize

    return pl.pallas_call(
        _hbm_copy_kernel,
        out_shape=jax.ShapeDtypeStruct(out_shape, x_seq.dtype),
        in_specs=[pl.BlockSpec(memory_space=pl.ANY)],
        out_specs=pl.BlockSpec(memory_space=pl.ANY),
        scratch_shapes=[pltpu.SemaphoreType.DMA(())],
        cost_estimate=pl.CostEstimate(
            flops=0, transcendentals=0, bytes_accessed=2 * nbytes),
    )(x_view)


if __name__ == "__main__":
    key = jax.random.PRNGKey(0)

    # Primary test: matches the module spec shapes.
    T, B, C, H, W = 2, 2, 4, 16, 16
    x = jax.random.normal(key, (T * B, C, H, W), dtype=jnp.float32)
    y = jax.block_until_ready(expand_temporal_dim(x, T))
    y_ref = jnp.reshape(x, (T, B, C, H, W))
    assert y.shape == (T, B, C, H, W), y.shape
    assert y.dtype == x.dtype
    assert bool(jnp.array_equal(y, y_ref)), "mismatch vs reference reshape"

    # Secondary test: odd, non-128-divisible shape (same single DMA path).
    T2, B2 = 2, 3
    x2 = jax.random.normal(key, (T2 * B2, 3, 5, 7), dtype=jnp.float32)
    y2 = jax.block_until_ready(expand_temporal_dim(x2, T2))
    y2_ref = jnp.reshape(x2, (T2, B2, 3, 5, 7))
    assert y2.shape == (T2, B2, 3, 5, 7), y2.shape
    assert bool(jnp.array_equal(y2, y2_ref)), "mismatch vs reference (odd shape)"

    # Tertiary test: bf16 dtype (no sublane-packing concerns with a DMA copy).
    x3 = jax.random.normal(key, (4, 8, 16, 16), dtype=jnp.bfloat16)
    y3 = jax.block_until_ready(expand_temporal_dim(x3, 2))
    assert bool(jnp.array_equal(y3, jnp.reshape(x3, (2, 2, 8, 16, 16))))

    print("KERNEL_OK")
</pallas_src>

<mosaic_0001>
module attributes {stable_mosaic.version = 11 : i64} {
  func.func @_hbm_copy_kernel(%arg0: memref<2x2x4x16x16xf32, #tpu.memory_space<any>>, %arg1: memref<2x2x4x16x16xf32, #tpu.memory_space<any>>, %arg2: memref<!tpu.dma_semaphore, #tpu.memory_space<semaphore_mem>>) attributes {dimension_semantics = [], scalar_prefetch = 0 : i64, scratch_operands = 1 : i64, tpu.core_type = #tpu.core_type<tc>} {
    tpu.enqueue_dma source(%arg0 : memref<2x2x4x16x16xf32, #tpu.memory_space<any>>) target(%arg1 : memref<2x2x4x16x16xf32, #tpu.memory_space<any>>) target_semaphore(%arg2 : memref<!tpu.dma_semaphore, #tpu.memory_space<semaphore_mem>>)
    tpu.wait_dma2 semaphore(%arg2 : memref<!tpu.dma_semaphore, #tpu.memory_space<semaphore_mem>>) src(%arg0 : memref<2x2x4x16x16xf32, #tpu.memory_space<any>>) dst(%arg1 : memref<2x2x4x16x16xf32, #tpu.memory_space<any>>)
    return
  }
}

</mosaic_0001>

<bundles_post_ra>
// kernel: tpu_custom_call.1
= control target key start
LH: loop header
LB: loop body
LE: loop exit
PB: predicated region body
PF: predicated region fallthrough
CT: control target
= control target key end

     0   :  { %s31_s6 = smov [#allocation2]   ;;  %s32_s7 = smov 131072   ;;  %s50_s0 = inlined_call_operand.hbm [shape: f32[2,2,4,16,16], index: 0, kind: input, shape index: {}]   ;;  %s51_s1 = inlined_call_operand.hbm [shape: f32[2,2,4,16,16], index: 1, kind: output, shape index: {}]  }
   0x1   :  { %s33_s8 = smov 0  }
   0x2   :  { %12 = dma.general %s50_s0, 4096, %s51_s1, %s31_s6, %s32_s7, [#allocation4], %s33_s8, 0  }
   0x3   :  { %29 = dma.done.wait [#allocation2], 4096 }
   0x4   :  { %30 = vsyncadd [#allocation2], 4294963200 }
   0x5   :  { %19 = vsyncmov [#allocation2] }
   0x8   :  { %s20_s13 = vpop.sfrf %19 }
   0x9   :  { %p25_p0 = scmp.ne.s32.totalorder %s20_s13, 0 }
   0xb   :  { %24 = shalt.err (%p25_p0)  }

</bundles_post_ra>
